<compile_context>
chip_gen: v7x
topology: tpu7x:2x2x1
jax: 0.10.0
libtpu: 0.0.40
codegen_flags: <defaults>
</compile_context>

<pallas_src>
import math
from functools import partial

import jax
import jax.numpy as jnp
from jax import lax
from jax.experimental import pallas as pl
from jax.experimental.pallas import tpu as pltpu


def _round_up(x, m):
    return ((x + m - 1) // m) * m


def _tpu_generation():
    try:
        kind = jax.devices()[0].device_kind.lower()
    except Exception:
        return None
    if "v7" in kind or "7x" in kind:
        return "v7"
    if "v6" in kind:
        return "v6"
    if "v5p" in kind:
        return "v5p"
    if "v5" in kind:
        return "v5"
    return None


def _tpu_vmem_and_generation():
    gen = _tpu_generation()
    vmem_cap = None
    try:
        vmem_cap = int(pltpu.get_tpu_info().vmem_capacity_bytes)
    except Exception:
        vmem_cap = None
    if not vmem_cap or vmem_cap <= 0:
        # Conservative fallbacks: 64 MiB on v7x / unknown, 128 MiB otherwise.
        vmem_cap = (128 << 20) if gen in ("v5", "v5p", "v6") else (64 << 20)
    return vmem_cap, gen


def _pick_tk(dp_in, max_tk=512):
    """Largest K tile <= max_tk that divides the (128-padded) input dim."""
    for tk in (512, 384, 256, 128):
        if tk <= max_tk and dp_in % tk == 0:
            return tk
    return 128


# ---------------------------------------------------------------------------
# Kernel bodies
# ---------------------------------------------------------------------------

def _mlp_epilogue(h, b1, gamma, beta, w2_ref, b2, o_ref, *, eps, h_valid,
                  h_padded, approximate_gelu, affine_dtype):
    """bias -> GELU -> LayerNorm -> affine -> (dropout=id) -> second matmul."""
    h = h + b1

    if approximate_gelu:
        # tanh-approx GELU: transcendental lands in the (otherwise idle) EUP.
        h = jax.nn.gelu(h, approximate=True)
    else:
        # Exact erf GELU (matches torch.nn.GELU default).
        h = 0.5 * h * (1.0 + lax.erf(h * (1.0 / math.sqrt(2.0))))

    # LayerNorm over the *valid* hidden lanes. Padded lanes of h are exactly
    # zero (zero-padded W1 columns / b1, GELU(0) == 0), so plain sums are
    # exact for the mean. Padded lanes of `centered` equal -mean, so their
    # contribution to the variance sum is subtracted analytically (a (tm,1)
    # correction) instead of masking the (tm, Hp) tensor.
    inv_h = 1.0 / h_valid
    mean = jnp.sum(h, axis=-1, keepdims=True) * inv_h
    centered = h - mean
    sq = jnp.sum(centered * centered, axis=-1, keepdims=True)
    if h_padded != h_valid:
        sq = sq - (h_padded - h_valid) * (mean * mean)
    var = sq * inv_h
    y = centered * lax.rsqrt(var + eps)

    # gamma/beta affine in affine_dtype (bf16 on v6e/v7x, f32 on v5e). Padded
    # lanes are zeroed by the zero-padded gamma/beta (and zero W2 rows).
    y = y.astype(affine_dtype)
    y = y * gamma + beta

    # Dropout is identity in eval / inference mode.
    # TODO(synk): training-mode dropout (pltpu.prng_* mask) not implemented.

    out = jnp.dot(y.astype(w2_ref.dtype), w2_ref[...],
                  preferred_element_type=jnp.float32)
    out = out + b2
    o_ref[...] = out.astype(o_ref.dtype)


def _mlp_kernel(x_ref, w1_ref, b1_ref, g_ref, be_ref, w2_ref, b2_ref, o_ref,
                *, eps, h_valid, h_padded, approximate_gelu, affine_dtype):
    # Fused single-pass kernel: W1 fully VMEM-resident.
    h = jnp.dot(x_ref[...], w1_ref[...], preferred_element_type=jnp.float32)
    _mlp_epilogue(h, b1_ref[...], g_ref[...], be_ref[...], w2_ref, b2_ref[...],
                  o_ref, eps=eps, h_valid=h_valid, h_padded=h_padded,
                  approximate_gelu=approximate_gelu, affine_dtype=affine_dtype)


def _mlp_kernel_ktiled(x_ref, w1_ref, b1_ref, g_ref, be_ref, w2_ref, b2_ref,
                       o_ref, acc_ref, *, eps, h_valid, h_padded,
                       approximate_gelu, affine_dtype):
    # K-tiled first matmul: W1 streamed over the trailing "arbitrary" grid
    # axis, accumulated in f32 VMEM scratch; epilogue runs on the last step.
    k = pl.program_id(1)

    @pl.when(k == 0)
    def _():
        acc_ref[...] = jnp.zeros_like(acc_ref)

    acc_ref[...] += jnp.dot(x_ref[...], w1_ref[...],
                            preferred_element_type=jnp.float32)

    @pl.when(k == pl.num_programs(1) - 1)
    def _():
        _mlp_epilogue(acc_ref[...], b1_ref[...], g_ref[...], be_ref[...],
                      w2_ref, b2_ref[...], o_ref, eps=eps, h_valid=h_valid,
                      h_padded=h_padded, approximate_gelu=approximate_gelu,
                      affine_dtype=affine_dtype)


# ---------------------------------------------------------------------------
# Parameter preparation (call ONCE, reuse across forward calls)
# ---------------------------------------------------------------------------

def _pad_2d(a, rows, cols, dtype):
    a = jnp.asarray(a)
    if a.ndim == 1:
        a = a.reshape(1, -1)
    if a.shape == (rows, cols):
        return a.astype(dtype)
    out = jnp.zeros((rows, cols), dtype)
    return out.at[:a.shape[0], :a.shape[1]].set(a.astype(dtype))


def prepare_mlp_params(params, *, mxu_dtype=jnp.bfloat16, affine_dtype=None):
    """Pad/cast the MLP parameters once (lane-dense, multiples of 128).

    mxu_dtype:    dtype fed to the MXU for x/W1/W2 (f32 accumulation always).
    affine_dtype: dtype of the LayerNorm gamma/beta affine. None -> bf16 on
                  v6e/v7x when mxu_dtype is bf16, else f32 (v5e has no bf16
                  VPU).
    """
    mxu_dtype = jnp.dtype(mxu_dtype)
    if affine_dtype is None:
        gen = _tpu_generation()
        affine_dtype = (jnp.bfloat16
                        if (mxu_dtype == jnp.dtype(jnp.bfloat16)
                            and gen in ("v6", "v7"))
                        else jnp.float32)
    affine_dtype = jnp.dtype(affine_dtype)

    w1, b1 = params["w1"], params["b1"]
    gamma, beta = params["gamma"], params["beta"]
    w2, b2 = params["w2"], params["b2"]

    D_in, H = w1.shape
    D_out = w2.shape[1]
    Dp_in = _round_up(D_in, 128)
    Hp = _round_up(H, 128)
    Dp_out = _round_up(D_out, 128)

    return {
        "_prepared": True,
        "mxu_dtype": mxu_dtype,
        "affine_dtype": affine_dtype,
        "dims": (D_in, H, D_out, Dp_in, Hp, Dp_out),
        "w1": _pad_2d(w1, Dp_in, Hp, mxu_dtype),
        "b1": _pad_2d(b1, 1, Hp, jnp.float32),           # added to f32 acc
        "gamma": _pad_2d(gamma, 1, Hp, affine_dtype),
        "beta": _pad_2d(beta, 1, Hp, affine_dtype),
        "w2": _pad_2d(w2, Hp, Dp_out, mxu_dtype),
        "b2": _pad_2d(b2, 1, Dp_out, jnp.float32),        # added to f32 out
    }


# ---------------------------------------------------------------------------
# Forward wrapper
# ---------------------------------------------------------------------------

def mlp_forward(feature, params, *, tm=None, eps=1e-5, approximate_gelu=True,
                k_block=None):
    """feature: (..., input_dim) -> (..., output_dim).

    params: either raw params (see init_mlp_params) or the result of
            prepare_mlp_params (preferred: pad/cast happens once, not per call).
    k_block: max K tile for the first matmul; None -> auto (K-tiling only when
             a fully-resident W1 would not fit the VMEM budget, e.g. v7x).
    """
    if not (isinstance(params, dict) and params.get("_prepared", False)):
        # Fallback convenience path; prefer calling prepare_mlp_params once.
        params = prepare_mlp_params(params)
    p = params
    mxu_dtype = p["mxu_dtype"]
    affine_dtype = p["affine_dtype"]
    D_in, H, D_out, Dp_in, Hp, Dp_out = p["dims"]

    *lead, d_in = feature.shape
    assert d_in == D_in, f"feature last dim {d_in} != input_dim {D_in}"
    N = math.prod(lead) if lead else 1
    out_dtype = feature.dtype

    vmem_cap, gen = _tpu_vmem_and_generation()

    # Row tiling: big tiles on 128-MiB-VMEM chips, <=256 on v7x / unknown.
    if tm is None:
        tm = 512 if gen in ("v5", "v5p", "v6") else 256
    tm_eff = min(tm, _round_up(N, 8))
    if gen == "v7" and N > 8 and N <= tm_eff:
        # v7x has 2 TensorCores: split a single-tile batch so both get work.
        tm_eff = max(8, _round_up(-(-N // 2), 8))
    N_pad = _round_up(N, tm_eff)

    # Activation staging: skip the zero-pad copy when already aligned.
    x2d = feature.reshape(N, D_in)
    if N_pad == N and Dp_in == D_in:
        x_p = x2d.astype(mxu_dtype)
    else:
        x_p = jnp.zeros((N_pad, Dp_in), mxu_dtype).at[:N, :D_in].set(
            x2d.astype(mxu_dtype))

    itm = mxu_dtype.itemsize
    aff_itm = affine_dtype.itemsize
    out_itm = jnp.dtype(out_dtype).itemsize
    budget = int(0.80 * vmem_cap)

    def vmem_est(tk, k_tiled):
        # Resident weights are single-buffered (Buffered(1)) -> count once.
        est = (2 * tm_eff * (tk if k_tiled else Dp_in) * itm      # x stream
               + ((2 * tk * Hp * itm) if k_tiled                  # W1 stream
                  else (Dp_in * Hp * itm))                        # W1 resident
               + Hp * Dp_out * itm                                # W2 resident
               + 2 * Hp * aff_itm + 4 * (Hp + Dp_out)             # b1/g/b/b2
               + 2 * tm_eff * Dp_out * out_itm                    # out stream
               + 3 * 4 * tm_eff * Hp)                             # f32 temps
        if k_tiled:
            est += 4 * tm_eff * Hp                                # acc scratch
        return est

    if k_block is not None:
        tk = _pick_tk(Dp_in, max_tk=int(k_block))
        use_k = (Dp_in // tk) > 1
    else:
        use_k = vmem_est(Dp_in, False) + (8 << 20) > budget
        tk = _pick_tk(Dp_in, max_tk=512) if use_k else Dp_in
        use_k = use_k and (Dp_in // tk) > 1
    if not use_k:
        tk = Dp_in

    # VMEM limit derived from chip capacity (0.8x) with explicit headroom for
    # the (tm, Hp) f32 intermediates and compiler-internal scratch.
    vmem_limit = int(min(max(vmem_est(tk, use_k) + (8 << 20), 32 << 20),
                         budget))

    cost = pl.CostEstimate(
        flops=2 * N * (D_in * H + H * D_out) + 10 * N * H,
        transcendentals=N * H,
        bytes_accessed=int(N_pad * Dp_in * itm
                           + (Dp_in * Hp + Hp * Dp_out) * itm
                           + 2 * Hp * aff_itm + 4 * (Hp + Dp_out)
                           + N_pad * Dp_out * out_itm),
    )

    kernel_kwargs = dict(eps=eps, h_valid=H, h_padded=Hp,
                         approximate_gelu=approximate_gelu,
                         affine_dtype=affine_dtype)
    grid_rows = N_pad // tm_eff

    def run(weight_buffer_count):
        if weight_buffer_count is None:
            res_kw = {}
        else:
            # Constant-index resident operands gain nothing from double
            # buffering -> request a single VMEM buffer each.
            res_kw = dict(
                pipeline_mode=pl.Buffered(buffer_count=weight_buffer_count))
        # TODO(synk): if profiling shows exposed DMA on the x/out row streams
        # (small H), raise their depth to pl.Buffered(3) while keeping the
        # resident weights at Buffered(1).
        if use_k:
            const = lambda i, k: (0, 0)
            grid = (grid_rows, Dp_in // tk)
            in_specs = [
                pl.BlockSpec((tm_eff, tk), lambda i, k: (i, k)),   # x rows/K
                pl.BlockSpec((tk, Hp), lambda i, k: (k, 0)),       # W1 K-slices
                pl.BlockSpec((1, Hp), const, **res_kw),            # b1
                pl.BlockSpec((1, Hp), const, **res_kw),            # gamma
                pl.BlockSpec((1, Hp), const, **res_kw),            # beta
                pl.BlockSpec((Hp, Dp_out), const, **res_kw),       # W2
                pl.BlockSpec((1, Dp_out), const, **res_kw),        # b2
            ]
            out_specs = pl.BlockSpec((tm_eff, Dp_out), lambda i, k: (i, 0))
            kernel = partial(_mlp_kernel_ktiled, **kernel_kwargs)
            scratch = [pltpu.VMEM((tm_eff, Hp), jnp.float32)]
            dims = ("parallel", "arbitrary")
        else:
            const = lambda i: (0, 0)
            grid = (grid_rows,)
            in_specs = [
                pl.BlockSpec((tm_eff, Dp_in), lambda i: (i, 0)),   # x rows
                pl.BlockSpec((Dp_in, Hp), const, **res_kw),        # W1
                pl.BlockSpec((1, Hp), const, **res_kw),            # b1
                pl.BlockSpec((1, Hp), const, **res_kw),            # gamma
                pl.BlockSpec((1, Hp), const, **res_kw),            # beta
                pl.BlockSpec((Hp, Dp_out), const, **res_kw),       # W2
                pl.BlockSpec((1, Dp_out), const, **res_kw),        # b2
            ]
            out_specs = pl.BlockSpec((tm_eff, Dp_out), lambda i: (i, 0))
            kernel = partial(_mlp_kernel, **kernel_kwargs)
            scratch = []
            dims = ("parallel",)
        return pl.pallas_call(
            kernel,
            out_shape=jax.ShapeDtypeStruct((N_pad, Dp_out), out_dtype),
            grid_spec=pltpu.PrefetchScalarGridSpec(
                num_scalar_prefetch=0,
                grid=grid,
                in_specs=in_specs,
                out_specs=out_specs,
                scratch_shapes=scratch,
            ),
            compiler_params=pltpu.CompilerParams(
                dimension_semantics=dims,
                vmem_limit_bytes=vmem_limit,
            ),
            cost_estimate=cost,
        )(x_p, p["w1"], p["b1"], p["gamma"], p["beta"], p["w2"], p["b2"])

    if hasattr(pl, "Buffered"):
        try:
            out_pad = run(1)
        except TypeError:
            # pipeline_mode= kwarg unsupported on this jax version only.
            out_pad = run(None)
    else:
        out_pad = run(None)

    if N_pad == N and Dp_out == D_out:
        out = out_pad
    else:
        out = out_pad[:N, :D_out]
    return out.reshape(*lead, D_out)


# ---------------------------------------------------------------------------
# Init + reference + self-test
# ---------------------------------------------------------------------------

def init_mlp_params(key, input_dim, hidden_dim, output_dim):
    """Deterministic init mirroring nn.Linear / nn.LayerNorm parameter shapes.
    Linear weights are stored transposed: (in, out)."""
    k1, k2, k3, k4 = jax.random.split(key, 4)
    lim1 = 1.0 / math.sqrt(input_dim)
    lim2 = 1.0 / math.sqrt(hidden_dim)
    return {
        "w1": jax.random.uniform(k1, (input_dim, hidden_dim), jnp.float32, -lim1, lim1),
        "b1": jax.random.uniform(k2, (hidden_dim,), jnp.float32, -lim1, lim1),
        "gamma": jnp.ones((hidden_dim,), jnp.float32),
        "beta": jnp.zeros((hidden_dim,), jnp.float32),
        "w2": jax.random.uniform(k3, (hidden_dim, output_dim), jnp.float32, -lim2, lim2),
        "b2": jax.random.uniform(k4, (output_dim,), jnp.float32, -lim2, lim2),
    }


def _reference_forward(feature, params, eps=1e-5, approximate_gelu=False):
    # Pure-JAX reference: Linear -> GELU -> LayerNorm -> (dropout=id) -> Linear.
    h = feature @ params["w1"] + params["b1"]
    if approximate_gelu:
        h = jax.nn.gelu(h, approximate=True)
    else:
        h = 0.5 * h * (1.0 + lax.erf(h / math.sqrt(2.0)))
    mean = jnp.mean(h, axis=-1, keepdims=True)
    var = jnp.mean((h - mean) ** 2, axis=-1, keepdims=True)
    h = (h - mean) / jnp.sqrt(var + eps)
    h = h * params["gamma"] + params["beta"]
    return h @ params["w2"] + params["b2"]


if __name__ == "__main__":
    key = jax.random.PRNGKey(0)
    k_x, k_p, k_x2, k_p2 = jax.random.split(key, 4)

    batch, seq = 2, 8
    input_dim, hidden_dim, output_dim = 32, 64, 16

    feature = jax.random.normal(k_x, (batch, seq, input_dim), jnp.float32)
    params = init_mlp_params(k_p, input_dim, hidden_dim, output_dim)

    ref_exact = _reference_forward(feature, params, approximate_gelu=False)
    ref_tanh = _reference_forward(feature, params, approximate_gelu=True)

    # 1) Exact path: f32 MXU, f32 elementwise, erf GELU -> tight tolerance.
    prep_f32 = prepare_mlp_params(params, mxu_dtype=jnp.float32,
                                  affine_dtype=jnp.float32)
    out_f32 = jax.block_until_ready(
        mlp_forward(feature, prep_f32, approximate_gelu=False))
    assert out_f32.shape == (batch, seq, output_dim)
    assert jnp.allclose(out_f32, ref_exact, atol=1e-4, rtol=1e-4), "f32 path mismatch"

    # 2) Default fast path: bf16 MXU (+ bf16 affine on v6e/v7x), tanh GELU.
    prep_fast = prepare_mlp_params(params)
    out_fast = jax.block_until_ready(mlp_forward(feature, prep_fast))
    assert out_fast.shape == (batch, seq, output_dim)
    assert jnp.allclose(out_fast, ref_tanh, atol=5e-2, rtol=5e-2), "bf16 path mismatch"

    # 3) K-tiled reduction path (auto-selected when W1 would not fit the VMEM
    #    budget, e.g. on v7x); forced here at a small size to validate it.
    input_dim2 = 256
    feature2 = jax.random.normal(k_x2, (batch, seq, input_dim2), jnp.float32)
    params2 = init_mlp_params(k_p2, input_dim2, hidden_dim, output_dim)
    ref2 = _reference_forward(feature2, params2, approximate_gelu=False)
    prep2 = prepare_mlp_params(params2, mxu_dtype=jnp.float32,
                               affine_dtype=jnp.float32)
    out2 = jax.block_until_ready(
        mlp_forward(feature2, prep2, approximate_gelu=False, k_block=128))
    assert out2.shape == (batch, seq, output_dim)
    assert jnp.allclose(out2, ref2, atol=1e-4, rtol=1e-4), "k-tiled path mismatch"

    print("KERNEL_OK")
</pallas_src>

<mosaic_0001>
module attributes {stable_mosaic.version = 11 : i64} {
  func.func @_mlp_kernel(%arg0: i32, %arg1: memref<16x128xf32, #tpu.memory_space<vmem>>, %arg2: memref<128x128xf32, #tpu.memory_space<vmem>>, %arg3: memref<1x128xf32, #tpu.memory_space<vmem>>, %arg4: memref<1x128xf32, #tpu.memory_space<vmem>>, %arg5: memref<1x128xf32, #tpu.memory_space<vmem>>, %arg6: memref<128x128xf32, #tpu.memory_space<vmem>>, %arg7: memref<1x128xf32, #tpu.memory_space<vmem>>, %arg8: memref<16x128xf32, #tpu.memory_space<vmem>>) attributes {dimension_semantics = [#tpu.dimension_semantics<parallel>], iteration_bounds = array<i64: 1>, scalar_prefetch = 0 : i64, scratch_operands = 0 : i64, tpu.core_type = #tpu.core_type<tc>, window_params = [{transform_indices = @transform_0, window_bounds = array<i64: 16, 128>}, {pipeline_mode = #tpu.pipeline_mode<synchronous>, transform_indices = @transform_1, window_bounds = array<i64: 128, 128>}, {pipeline_mode = #tpu.pipeline_mode<synchronous>, transform_indices = @transform_2, window_bounds = array<i64: 1, 128>}, {pipeline_mode = #tpu.pipeline_mode<synchronous>, transform_indices = @transform_3, window_bounds = array<i64: 1, 128>}, {pipeline_mode = #tpu.pipeline_mode<synchronous>, transform_indices = @transform_4, window_bounds = array<i64: 1, 128>}, {pipeline_mode = #tpu.pipeline_mode<synchronous>, transform_indices = @transform_5, window_bounds = array<i64: 128, 128>}, {pipeline_mode = #tpu.pipeline_mode<synchronous>, transform_indices = @transform_6, window_bounds = array<i64: 1, 128>}, {transform_indices = @transform_7, window_bounds = array<i64: 16, 128>}]} {
    %c0 = arith.constant 0 : index
    %c0_0 = arith.constant 0 : index
    %0 = vector.load %arg1[%c0, %c0_0] : memref<16x128xf32, #tpu.memory_space<vmem>>, vector<16x128xf32>
    %c0_1 = arith.constant 0 : index
    %c0_2 = arith.constant 0 : index
    %1 = vector.load %arg2[%c0_1, %c0_2] : memref<128x128xf32, #tpu.memory_space<vmem>>, vector<128x128xf32>
    %cst = arith.constant dense<0.000000e+00> : vector<16x128xf32>
    %2 = tpu.matmul %0, %1, %cst {dimension_numbers = #tpu.dot_dimension_numbers<[1], [0], [0], [1], [0, 0, 1, 1], [], []>} : vector<16x128xf32>, vector<128x128xf32>, vector<16x128xf32> -> vector<16x128xf32>
    %c0_3 = arith.constant 0 : index
    %c0_4 = arith.constant 0 : index
    %3 = vector.load %arg3[%c0_3, %c0_4] : memref<1x128xf32, #tpu.memory_space<vmem>>, vector<1x128xf32>
    %c0_5 = arith.constant 0 : index
    %c0_6 = arith.constant 0 : index
    %4 = vector.load %arg4[%c0_5, %c0_6] : memref<1x128xf32, #tpu.memory_space<vmem>>, vector<1x128xf32>
    %c0_7 = arith.constant 0 : index
    %c0_8 = arith.constant 0 : index
    %5 = vector.load %arg5[%c0_7, %c0_8] : memref<1x128xf32, #tpu.memory_space<vmem>>, vector<1x128xf32>
    %c0_9 = arith.constant 0 : index
    %c0_10 = arith.constant 0 : index
    %6 = vector.load %arg7[%c0_9, %c0_10] : memref<1x128xf32, #tpu.memory_space<vmem>>, vector<1x128xf32>
    %7 = vector.broadcast %3 : vector<1x128xf32> to vector<16x128xf32>
    %8 = arith.addf %2, %7 : vector<16x128xf32>
    %cst_11 = arith.constant 5.000000e-01 : f32
    %9 = vector.broadcast %cst_11 : f32 to vector<16x128xf32>
    %10 = arith.mulf %9, %8 : vector<16x128xf32>
    %cst_12 = arith.constant 0.707106769 : f32
    %11 = vector.broadcast %cst_12 : f32 to vector<16x128xf32>
    %12 = arith.mulf %8, %11 : vector<16x128xf32>
    %13 = math.erf %12 : vector<16x128xf32>
    %cst_13 = arith.constant 1.000000e+00 : f32
    %14 = vector.broadcast %cst_13 : f32 to vector<16x128xf32>
    %15 = arith.addf %14, %13 : vector<16x128xf32>
    %16 = arith.mulf %10, %15 : vector<16x128xf32>
    %cst_14 = arith.constant dense<0.000000e+00> : vector<16xf32>
    %17 = vector.multi_reduction <add>, %16, %cst_14 [1] : vector<16x128xf32> to vector<16xf32>
    %18 = vector.shape_cast %17 : vector<16xf32> to vector<16x1xf32>
    %cst_15 = arith.constant 1.562500e-02 : f32
    %19 = vector.broadcast %cst_15 : f32 to vector<16x1xf32>
    %20 = arith.mulf %18, %19 : vector<16x1xf32>
    %21 = vector.broadcast %20 : vector<16x1xf32> to vector<16x128xf32>
    %22 = arith.subf %16, %21 : vector<16x128xf32>
    %23 = arith.mulf %22, %22 : vector<16x128xf32>
    %cst_16 = arith.constant dense<0.000000e+00> : vector<16xf32>
    %24 = vector.multi_reduction <add>, %23, %cst_16 [1] : vector<16x128xf32> to vector<16xf32>
    %25 = vector.shape_cast %24 : vector<16xf32> to vector<16x1xf32>
    %26 = arith.mulf %20, %20 : vector<16x1xf32>
    %cst_17 = arith.constant 6.400000e+01 : f32
    %27 = vector.broadcast %cst_17 : f32 to vector<16x1xf32>
    %28 = arith.mulf %27, %26 : vector<16x1xf32>
    %29 = arith.subf %25, %28 : vector<16x1xf32>
    %cst_18 = arith.constant 1.562500e-02 : f32
    %30 = vector.broadcast %cst_18 : f32 to vector<16x1xf32>
    %31 = arith.mulf %29, %30 : vector<16x1xf32>
    %cst_19 = arith.constant 9.99999974E-6 : f32
    %32 = vector.broadcast %cst_19 : f32 to vector<16x1xf32>
    %33 = arith.addf %31, %32 : vector<16x1xf32>
    %34 = math.rsqrt %33 : vector<16x1xf32>
    %35 = vector.broadcast %34 : vector<16x1xf32> to vector<16x128xf32>
    %36 = arith.mulf %22, %35 : vector<16x128xf32>
    %37 = vector.broadcast %4 : vector<1x128xf32> to vector<16x128xf32>
    %38 = arith.mulf %36, %37 : vector<16x128xf32>
    %39 = vector.broadcast %5 : vector<1x128xf32> to vector<16x128xf32>
    %40 = arith.addf %38, %39 : vector<16x128xf32>
    %c0_20 = arith.constant 0 : index
    %c0_21 = arith.constant 0 : index
    %41 = vector.load %arg6[%c0_20, %c0_21] : memref<128x128xf32, #tpu.memory_space<vmem>>, vector<128x128xf32>
    %cst_22 = arith.constant dense<0.000000e+00> : vector<16x128xf32>
    %42 = tpu.matmul %40, %41, %cst_22 {dimension_numbers = #tpu.dot_dimension_numbers<[1], [0], [0], [1], [0, 0, 1, 1], [], []>} : vector<16x128xf32>, vector<128x128xf32>, vector<16x128xf32> -> vector<16x128xf32>
    %43 = vector.broadcast %6 : vector<1x128xf32> to vector<16x128xf32>
    %44 = arith.addf %42, %43 : vector<16x128xf32>
    %c0_23 = arith.constant 0 : index
    %c0_24 = arith.constant 0 : index
    %45 = vector.load %arg8[%c0_23, %c0_24] : memref<16x128xf32, #tpu.memory_space<vmem>>, vector<16x128xf32>
    tpu.vector_store %arg8[%c0_23, %c0_24], %44 {strides = array<i32>} : memref<16x128xf32, #tpu.memory_space<vmem>>, vector<16x128xf32>,
    return
  }
  func.func @transform_0(%arg0: i32) -> (i32, i32) {
    %c0_i32 = arith.constant 0 : i32
    %c0_i32_0 = arith.constant 0 : i32
    return %arg0, %c0_i32 : i32, i32
  }
  func.func @transform_1(%arg0: i32) -> (i32, i32) {
    %c0_i32 = arith.constant 0 : i32
    %c0_i32_0 = arith.constant 0 : i32
    %c0_i32_1 = arith.constant 0 : i32
    return %c0_i32, %c0_i32_0 : i32, i32
  }
  func.func @transform_2(%arg0: i32) -> (i32, i32) {
    %c0_i32 = arith.constant 0 : i32
    %c0_i32_0 = arith.constant 0 : i32
    %c0_i32_1 = arith.constant 0 : i32
    return %c0_i32, %c0_i32_0 : i32, i32
  }
  func.func @transform_3(%arg0: i32) -> (i32, i32) {
    %c0_i32 = arith.constant 0 : i32
    %c0_i32_0 = arith.constant 0 : i32
    %c0_i32_1 = arith.constant 0 : i32
    return %c0_i32, %c0_i32_0 : i32, i32
  }
  func.func @transform_4(%arg0: i32) -> (i32, i32) {
    %c0_i32 = arith.constant 0 : i32
    %c0_i32_0 = arith.constant 0 : i32
    %c0_i32_1 = arith.constant 0 : i32
    return %c0_i32, %c0_i32_0 : i32, i32
  }
  func.func @transform_5(%arg0: i32) -> (i32, i32) {
    %c0_i32 = arith.constant 0 : i32
    %c0_i32_0 = arith.constant 0 : i32
    %c0_i32_1 = arith.constant 0 : i32
    return %c0_i32, %c0_i32_0 : i32, i32
  }
  func.func @transform_6(%arg0: i32) -> (i32, i32) {
    %c0_i32 = arith.constant 0 : i32
    %c0_i32_0 = arith.constant 0 : i32
    %c0_i32_1 = arith.constant 0 : i32
    return %c0_i32, %c0_i32_0 : i32, i32
  }
  func.func @transform_7(%arg0: i32) -> (i32, i32) {
    %c0_i32 = arith.constant 0 : i32
    %c0_i32_0 = arith.constant 0 : i32
    return %arg0, %c0_i32 : i32, i32
  }
}

</mosaic_0001>

<bundles_post_ra>
// kernel: tpu_custom_call.1
= control target key start
LH: loop header
LB: loop body
LE: loop exit
PB: predicated region body
PF: predicated region fallthrough
CT: control target
= control target key end

     0   :  { %12 = vsyncpa [#allocation3], 0  ;;  %s749_s0 = inlined_call_operand.hbm [shape: f32[16,128], index: 0, kind: input, shape index: {}]   ;;  %s750_s1 = inlined_call_operand.hbm [shape: f32[128,128], index: 1, kind: input, shape index: {}]   ;;  %s751_s2 = inlined_call_operand.vmem [shape: f32[1,128], index: 2, kind: input, shape index: {}]   ;;  %s752_s3 = inlined_call_operand.vmem [shape: f32[1,128], index: 3, kind: input, shape index: {}]   ;;  %s753_s4 = inlined_call_operand.vmem [shape: f32[1,128], index: 4, kind: input, shape index: {}]   ;;  %s754_s5 = inlined_call_operand.hbm [shape: f32[128,128], index: 5, kind: input, shape index: {}]   ;;  %s755_s6 = inlined_call_operand.vmem [shape: f32[1,128], index: 6, kind: input, shape index: {}]   ;;  %s756_s7 = inlined_call_operand.hbm [shape: f32[16,128], index: 7, kind: output, shape index: {}]  }
   0x1   :  { %13 = vsyncpa [#allocation6], 0 }
   0x2   :  { %14 = vsyncpa [#allocation4], 0  ;;  %s624_s24 = smov [#allocation5]   ;;  %s625_s26 = smov [#allocation2]  }
   0x3   :  { %s32_s25 = sshll.u32 %s624_s24, 4  ;;  %s20_s27 = sshll.u32 %s625_s26, 4  ;;  %s33_s25 = int_to_ptr.vmem [resolvable:$true] %s32_s25  ;;  %s670_s27 = int_to_ptr.vmem [resolvable:$true] %s20_s27 }
   0x4   :  { %s530_s30 = scalar_lea.hbm %s750_s1, 2048 }
   0x5   :  { %p531_p0 = scmp.ne.s32.totalorder %s750_s1, %s530_s30  ;;  %p534_p1 = scmp.lt.u32.totalorder %s530_s30, %s750_s1 }
   0x7   :  { %p536_p2 = pnand %p534_p1, %p531_p0 }
   0x9   :  { %539 = shalt.err (!%p536_p2)
}
   0xa   :  { %s540_s12 = scalar_lea.vmem %s33_s25, 2048  ;;  %p545_p4 = scmp.lt.s32.totalorder %s33_s25, %s33_s25 }
   0xb   :  { %p541_p3 = scmp.ne.s32.totalorder %s33_s25, %s540_s12  ;;  %p546_p5 = scmp.lt.s32.totalorder %s540_s12, %s540_s12 }
   0xd   :  { %p547_p6 = por %p546_p5, %p545_p4 }
   0xf   :  { %p548_p7 = pnand %p547_p6, %p541_p3 }
  0x11   :  { %551 = shalt.err (!%p548_p7)
}
  0x12   :  { %s626_s13 = smov 128   ;;  %s627_s14 = smov 8  }
  0x13   :  { %38 = dma.hbm_to_vmem [thread:$0]  %s750_s1, 2048, %s33_s25, [#allocation6], %s626_s13, %s626_s13, %s627_s14  }
  0x14   :  { %s552_s19 = scalar_lea.hbm %s749_s0, 256 }
  0x15   :  { %p553_p8 = scmp.ne.s32.totalorder %s749_s0, %s552_s19  ;;  %p556_p9 = scmp.lt.u32.totalorder %s552_s19, %s749_s0 }
  0x17   :  { %p558_p10 = pnand %p556_p9, %p553_p8 }
  0x19   :  { %561 = shalt.err (!%p558_p10)
}
  0x1a   :  { %s562_s24 = scalar_lea.vmem %s670_s27, 256  ;;  %p567_p12 = scmp.lt.s32.totalorder %s670_s27, %s670_s27 }
  0x1b   :  { %p563_p11 = scmp.ne.s32.totalorder %s670_s27, %s562_s24  ;;  %p568_p13 = scmp.lt.s32.totalorder %s562_s24, %s562_s24 }
  0x1d   :  { %p569_p0 = por %p568_p13, %p567_p12 }
  0x1f   :  { %p570_p1 = pnand %p569_p0, %p563_p11 }
  0x21   :  { %573 = shalt.err (!%p570_p1)
}
  0x22   :  { %26 = dma.hbm_to_vmem [thread:$0]  %s749_s0, 256, %s670_s27, [#allocation3], %s626_s13, %s626_s13, %s627_s14  }
  0x23   :  { %s628_s26 = smov [#allocation7]   ;;  %s574_s8 = scalar_lea.hbm %s754_s5, 2048 }
  0x24   :  { %s50_s28 = sshll.u32 %s628_s26, 4  ;;  %p575_p2 = scmp.ne.s32.totalorder %s754_s5, %s574_s8  ;;  %s51_s28 = int_to_ptr.vmem [resolvable:$true] %s50_s28 }
  0x25   :  { %p578_p3 = scmp.lt.u32.totalorder %s574_s8, %s754_s5 }
  0x27   :  { %p580_p4 = pnand %p578_p3, %p575_p2 }
  0x29   :  { %583 = shalt.err (!%p580_p4)
}
  0x2a   :  { %s584_s15 = scalar_lea.vmem %s51_s28, 2048  ;;  %p589_p6 = scmp.lt.s32.totalorder %s51_s28, %s51_s28 }
  0x2b   :  { %p585_p5 = scmp.ne.s32.totalorder %s51_s28, %s584_s15  ;;  %p590_p7 = scmp.lt.s32.totalorder %s584_s15, %s584_s15 }
  0x2d   :  { %p591_p8 = por %p590_p7, %p589_p6 }
  0x2f   :  { %p592_p9 = pnand %p591_p8, %p585_p5 }
  0x31   :  { %595 = shalt.err (!%p592_p9)
}
  0x32   :  { %56 = dma.hbm_to_vmem [thread:$0]  %s754_s5, 2048, %s51_s28, [#allocation6], %s626_s13, %s626_s13, %s627_s14  }
  0x33   :  { %618 = dma.done.wait [#allocation3], 256  }
  0x34   :  { %619 = vsyncadd [#allocation3], 4294967040 }
  0x35   :  { %620 = dma.done.wait [#allocation6], 4096  }
  0x36   :  { %621 = vsyncadd [#allocation6], 4294963200  ;;  %v70_v0 = vld [vmem:[#allocation5] sm:$0xff]  ;;  %v71_v1 = vld [vmem:[#allocation5 + $0x8] sm:$0xff]  ;;  %s629_s22 = smov [#allocation8]  }
  0x37   :  { %v72_v2 = vld [vmem:[#allocation5 + $0x10] sm:$0xff]  ;;  %v452_v3 = vpack.c.bf16 %v71_v1, %v70_v0  ;;  %v73_v4 = vld [vmem:[#allocation5 + $0x18] sm:$0xff]  ;;  %v74_v6 = vld [vmem:[#allocation5 + $0x20] sm:$0xff]  ;;  %s329_s23 = sshll.u32 %s629_s22, 4  ;;  %s330_s23 = int_to_ptr.vmem [resolvable:$true] %s329_s23 }
  0x38   :  { %v456_v5 = vpack.c.bf16 %v73_v4, %v72_v2  ;;  %v75_v7 = vld [vmem:[#allocation5 + $0x28] sm:$0xff]  ;;  %v68_v9 = vld [vmem:[#allocation2] sm:$0xff]  ;;  %v77_v11 = vld [vmem:[#allocation5 + $0x38] sm:$0xff]  ;;  %p601_p11 = scmp.lt.s32.totalorder %s330_s23, %s330_s23 }
  0x39   :  { %453 = vmatprep.subr.bf16.mxu0 %v452_v3  ;;  %v460_v8 = vpack.c.bf16 %v75_v7, %v74_v6  ;;  %v76_v10 = vld [vmem:[#allocation5 + $0x30] sm:$0xff]  ;;  %414 = vmatprep.mubr.f32.mxu0 %v68_v9  ;;  %v78_v13 = vld [vmem:[#allocation5 + $0x40] sm:$0xff]  ;;  %v79_v14 = vld [vmem:[#allocation5 + $0x48] sm:$0xff] }
  0x3a   :  { %455 = vmatpush3.bf16.msra.mxu0 %v452_v3  ;;  %v464_v12 = vpack.c.bf16 %v77_v11, %v76_v10  ;;  %v468_v15 = vpack.c.bf16 %v79_v14, %v78_v13  ;;  %v80_v16 = vld [vmem:[#allocation5 + $0x50] sm:$0xff]  ;;  %v81_v17 = vld [vmem:[#allocation5 + $0x58] sm:$0xff]  ;;  %v82_v19 = vld [vmem:[#allocation5 + $0x60] sm:$0xff] }
  0x3b   :  { %457 = vmatprep.subr.bf16.mxu0 %v456_v5  ;;  %v472_v18 = vpack.c.bf16 %v81_v17, %v80_v16  ;;  %v83_v20 = vld [vmem:[#allocation5 + $0x68] sm:$0xff]  ;;  %v84_v22 = vld [vmem:[#allocation5 + $0x70] sm:$0xff]  ;;  %v85_v23 = vld [vmem:[#allocation5 + $0x78] sm:$0xff] }
  0x3c   :  { %v476_v21 = vpack.c.bf16 %v83_v20, %v82_v19  ;;  %v480_v24 = vpack.c.bf16 %v85_v23, %v84_v22  ;;  %v69_v25 = vld [vmem:[#allocation2 + $0x8] sm:$0xff]  ;;  %v342_v26 = vld [vmem:[%s751_s2] ss:$0 sm:$0xff]  ;;  %v225_v41 = vld [vmem:[#allocation7] sm:$0xff] }
  0x3d   :  { %v226_v42 = vld [vmem:[#allocation7 + $0x8] sm:$0xff]  ;;  %v227_v43 = vld [vmem:[#allocation7 + $0x10] sm:$0xff]  ;;  %v228_v45 = vld [vmem:[#allocation7 + $0x18] sm:$0xff] }
  0x3e   :  { %459 = vmatpush3.bf16.msra.mxu0 %v456_v5  ;;  %v484_v44 = vpack.c.bf16 %v226_v42, %v225_v41  ;;  %v488_v46 = vpack.c.bf16 %v228_v45, %v227_v43  ;;  %v229_v55 = vld [vmem:[#allocation7 + $0x20] sm:$0xff]  ;;  %v230_v56 = vld [vmem:[#allocation7 + $0x28] sm:$0xff]  ;;  %v231_v58 = vld [vmem:[#allocation7 + $0x30] sm:$0xff] }
  0x3f   :  { %461 = vmatprep.subr.bf16.mxu0 %v460_v8  ;;  %v492_v57 = vpack.c.bf16 %v230_v56, %v229_v55  ;;  %v232_v59 = vld [vmem:[#allocation7 + $0x38] sm:$0xff]  ;;  %v233_v61 = vld [vmem:[#allocation7 + $0x40] sm:$0xff]  ;;  %v234_v62 = vld [vmem:[#allocation7 + $0x48] sm:$0xff] }
  0x40   :  { %485 = vmatprep.subr.bf16.mxu1 %v484_v44  ;;  %v496_v60 = vpack.c.bf16 %v232_v59, %v231_v58  ;;  %v500_v63 = vpack.c.bf16 %v234_v62, %v233_v61  ;;  %v235_v0 = vld [vmem:[#allocation7 + $0x50] sm:$0xff]  ;;  %v236_v1 = vld [vmem:[#allocation7 + $0x58] sm:$0xff]  ;;  %v237_v2 = vld [vmem:[#allocation7 + $0x60] sm:$0xff] }
  0x41   :  { %487 = vmatpush3.bf16.msra.mxu1 %v484_v44  ;;  %v504_v3 = vpack.c.bf16 %v236_v1, %v235_v0  ;;  %v238_v4 = vld [vmem:[#allocation7 + $0x68] sm:$0xff]  ;;  %v239_v6 = vld [vmem:[#allocation7 + $0x70] sm:$0xff]  ;;  %v240_v7 = vld [vmem:[#allocation7 + $0x78] sm:$0xff] }
  0x42   :  { %463 = vmatpush3.bf16.msra.mxu0 %v460_v8  ;;  %489 = vmatprep.subr.bf16.mxu1 %v488_v46  ;;  %v508_v5 = vpack.c.bf16 %v238_v4, %v237_v2  ;;  %v512_v8 = vpack.c.bf16 %v240_v7, %v239_v6  ;;  %v343_v22 = vld [vmem:[%s752_s3] ss:$0 sm:$0xff]  ;;  %s596_s3 = scalar_lea.vmem %s330_s23, 256 }
  0x43   :  { %465 = vmatprep.subr.bf16.mxu0 %v464_v12  ;;  %p597_p10 = scmp.ne.s32.totalorder %s330_s23, %s596_s3  ;;  %p602_p12 = scmp.lt.s32.totalorder %s596_s3, %s596_s3 }
  0x45   :  { %491 = vmatpush3.bf16.msra.mxu1 %v488_v46  ;;  %p603_p13 = por %p602_p12, %p601_p11 }
  0x46   :  { %467 = vmatpush3.bf16.msra.mxu0 %v464_v12  ;;  %493 = vmatprep.subr.bf16.mxu1 %v492_v57 }
  0x47   :  { %469 = vmatprep.subr.bf16.mxu0 %v468_v15  ;;  %p604_p0 = pnand %p603_p13, %p597_p10 }
  0x49   :  { %495 = vmatpush3.bf16.msra.mxu1 %v492_v57 }
  0x4a   :  { %471 = vmatpush3.bf16.msra.mxu0 %v468_v15  ;;  %497 = vmatprep.subr.bf16.mxu1 %v496_v60 }
  0x4b   :  { %473 = vmatprep.subr.bf16.mxu0 %v472_v18 }
  0x4d   :  { %499 = vmatpush3.bf16.msra.mxu1 %v496_v60 }
  0x4e   :  { %475 = vmatpush3.bf16.msra.mxu0 %v472_v18  ;;  %501 = vmatprep.subr.bf16.mxu1 %v500_v63 }
  0x4f   :  { %477 = vmatprep.subr.bf16.mxu0 %v476_v21 }
  0x51   :  { %503 = vmatpush3.bf16.msra.mxu1 %v500_v63 }
  0x52   :  { %479 = vmatpush3.bf16.msra.mxu0 %v476_v21  ;;  %505 = vmatprep.subr.bf16.mxu1 %v504_v3 }
  0x53   :  { %481 = vmatprep.subr.bf16.mxu0 %v480_v24 }
  0x55   :  { %507 = vmatpush3.bf16.msra.mxu1 %v504_v3 }
  0x56   :  { %483 = vmatpush3.bf16.msra.mxu0 %v480_v24  ;;  %509 = vmatprep.subr.bf16.mxu1 %v508_v5  ;;  %v344_v24 = vld [vmem:[%s753_s4] ss:$0 sm:$0xff] }
  0x59   :  { %415 = vmatmul.mubr.f32.vlgmr.msra.gmra.mrb[0].mxu0 %v69_v25  ;;  %511 = vmatpush3.bf16.msra.mxu1 %v508_v5 }
  0x5a   :  { %513 = vmatprep.subr.bf16.mxu1 %v512_v8 }
  0x5d   :  { %515 = vmatpush3.bf16.msra.mxu1 %v512_v8 }
 0x12c   :  { %v416_v27 = vpop.f32.mrb[0].mxu0 }
 0x12d   :  { %v168_v28 = vadd.f32 %v416_v27, %v342_v26  ;;  %v162_v29 = vpop.f32.mrb[1].mxu0 }
 0x12e   :  { %v163_v30 = vadd.f32 %v342_v26, %v162_v29 }
 0x12f   :  { %v174_v31 = vmul.f32 0.70710677, %v168_v28  ;;  %v172_v39 = vmul.f32 0.5, %v168_v28 }
 0x130   :  { %v173_v32 = vmul.f32 0.70710677, %v163_v30  ;;  %v171_v35 = vmul.f32 0.5, %v163_v30 }
 0x131   :  { %522 = verf.f32 %v174_v31  ;;  %v345_v31 = vld [vmem:[%s755_s6] ss:$0 sm:$0xff] }
 0x132   :  { %524 = verf.f32 %v173_v32 }
 0x13b   :  { %v523_v33 = vpop.eup %522 }
 0x13c   :  { %v525_v34 = vpop.eup %524  ;;  %v178_v38 = vadd.f32 1.0, %v523_v33 }
 0x13d   :  { %v177_v36 = vadd.f32 1.0, %v525_v34 }
 0x13e   :  { %v180_v40 = vmul.f32 %v178_v38, %v172_v39 }
 0x13f   :  { %v179_v37 = vmul.f32 %v177_v36, %v171_v35 }
 0x141   :  { %181 = vadd.xlane.f32.xlu0 %v179_v37 }
 0x145   :  { %183 = vadd.xlane.f32.xlu0 %v180_v40 }
 0x1ce   :  { %v182_v47 = vpop.xlane.xlu0 %181 }
 0x1cf   :  { %v185_v48 = vmul.f32 0.015625, %v182_v47 }
 0x1d1   :  { %v187_v49 = vsub.f32 %v179_v37, %v185_v48  ;;  %v195_v9 = vmul.f32 %v185_v48, %v185_v48 }
 0x1d2   :  { %v184_v50 = vpop.xlane.xlu0 %183 }
 0x1d3   :  { %v186_v51 = vmul.f32 0.015625, %v184_v50  ;;  %v189_v52 = vmul.f32 %v187_v49, %v187_v49  ;;  %v197_v11 = vmul.f32 64.0, %v195_v9 }
 0x1d5   :  { %v188_v53 = vsub.f32 %v180_v40, %v186_v51  ;;  %191 = vadd.xlane.f32.xlu1 %v189_v52  ;;  %v196_v10 = vmul.f32 %v186_v51, %v186_v51 }
 0x1d7   :  { %v190_v54 = vmul.f32 %v188_v53, %v188_v53  ;;  %v198_v14 = vmul.f32 64.0, %v196_v10 }
 0x1d9   :  { %193 = vadd.xlane.f32.xlu1 %v190_v54 }
 0x262   :  { %v192_v12 = vpop.xlane.xlu1 %191 }
 0x263   :  { %v199_v13 = vsub.f32 %v192_v12, %v197_v11 }
 0x265   :  { %v201_v15 = vmul.f32 0.015625, %v199_v13 }
 0x266   :  { %v194_v16 = vpop.xlane.xlu1 %193 }
 0x267   :  { %v203_v17 = vadd.f32 1e-05, %v201_v15  ;;  %v200_v18 = vsub.f32 %v194_v16, %v198_v14 }
 0x269   :  { %526 = vrsqrt.f32 %v203_v17  ;;  %v202_v19 = vmul.f32 0.015625, %v200_v18 }
 0x26b   :  { %v204_v20 = vadd.f32 1e-05, %v202_v19 }
 0x26d   :  { %528 = vrsqrt.f32 %v204_v20 }
 0x273   :  { %v527_v21 = vpop.eup %526 }
 0x274   :  { %v207_v23 = vmul.f32 %v527_v21, %v187_v49 }
 0x276   :  { %v215_v25 = vmul.f32 %v343_v22, %v207_v23 }
 0x277   :  { %v529_v26 = vpop.eup %528 }
 0x278   :  { %v208_v27 = vmul.f32 %v529_v26, %v188_v53  ;;  %v223_v28 = vadd.f32 %v344_v24, %v215_v25 }
 0x27a   :  { %v216_v29 = vmul.f32 %v343_v22, %v208_v27  ;;  %449 = vmatprep.mubr.f32.mxu1 %v223_v28 }
 0x27c   :  { %v224_v30 = vadd.f32 %v344_v24, %v216_v29 }
 0x27e   :  { %450 = vmatmul.mubr.f32.vlgmr.msra.gmra.mrb[0].mxu1 %v224_v30 }
 0x351   :  { %v451_v32 = vpop.f32.mrb[0].mxu1 }
 0x352   :  { %v319_v33 = vadd.f32 %v451_v32, %v345_v31  ;;  %v313_v34 = vpop.f32.mrb[1].mxu1 }
 0x353   :  { %v314_v35 = vadd.f32 %v345_v31, %v313_v34 }
 0x354   :  { %323 = vst [vmem:[#allocation8 + $0x8] sm:$0xff] %v319_v33 }
 0x355   :  { %322 = vst [vmem:[#allocation8] sm:$0xff] %v314_v35 }
 0x356   :  { %607 = shalt.err (!%p604_p0)
}
 0x357   :  { %s608_s6 = scalar_lea.hbm %s756_s7, 256 }
 0x358   :  { %p609_p1 = scmp.ne.s32.totalorder %s756_s7, %s608_s6  ;;  %p612_p2 = scmp.lt.u32.totalorder %s608_s6, %s756_s7 }
 0x35a   :  { %p614_p3 = pnand %p612_p2, %p609_p1 }
 0x35c   :  { %617 = shalt.err (!%p614_p3)
}
 0x35d   :  { %335 = dma.vmem_to_hbm [thread:$0]  %s330_s23, 256, %s756_s7, [#allocation4], %s626_s13, %s626_s13, %s627_s14  }
 0x35e   :  { %622 = dma.done.wait [#allocation4], 256  }
 0x35f   :  { %623 = vsyncadd [#allocation4], 4294967040 }
 0x360   :  { %339 = vsyncpa [#allocation3], 1 }
 0x361   :  { %340 = vsyncpa [#allocation6], 1 }
 0x362   :  { %341 = vsyncpa [#allocation4], 1 }

</bundles_post_ra>
